<compile_context>
chip_gen: v7x
topology: tpu7x:2x2x1
jax: 0.10.0
libtpu: 0.0.40
codegen_flags: <defaults>
</compile_context>

<pallas_src>
import jax
import jax.numpy as jnp
from jax import lax
from jax.experimental import pallas as pl
from jax.experimental.pallas import tpu as pltpu

# ----- small synthetic config (consistent with the module's __init__) -----
B = 2                 # batch
C = 4                 # cfg.DATASET.CHANNELS
T = 16                # cfg.DATASET.POINTS
S = 8                 # cfg.MODEL.ARGS.SOURCE_CHANNELS
K = 7                 # VARConv kernel size
P = 16                # cfg.MODEL.ARGS.PROJECTION_DIM
L = T - K + 1         # per-sample 'valid' conv length (10)
LP = L // 2           # after MaxPool2d((1, 2), (1, 2)) over time (5)
NF = S * LP           # cfg.MODEL.ARGS.N_FEATURES (flattened backbone feature)
V = 2                 # two contrastive views, fused into one kernel call
N = V * B             # total samples processed per call (4)
LANES = 128           # padded fused-time lane width (N*T = 64 <= 128)
SLAB_R = 56           # parameter slab rows (49 used, padded to a multiple of 8)
NEG_SLOPE = 0.01      # nn.LeakyReLU default


def _clr_kernel(x_ref, p_ref, out_ref):
    """Whole forward (both views, whole batch) in one invocation.

    x_ref  : (K*C, 128)  input im2col; row k*C+m, column c holds x[m, c+k].
    p_ref  : (56, 128)   packed parameter slab (see wrapper for layout).
    out_ref: (LP+1, N, P) merged output; [:LP,:,:S] = pooled h (j,n,s order),
             [LP] = L2-normalized projection z.
    """
    # ---- effective temporal conv (Spatial Linear ∘ VARConv, composed) ----
    a_p = p_ref[0:S, 0:K * C]                          # (8, 28)
    b_eff = p_ref[0:S, K * C:K * C + 1]                # (8, 1)
    y = jnp.dot(a_p, x_ref[...],
                preferred_element_type=jnp.float32) + b_eff      # (8, 128)

    # ---- LeakyReLU ----
    y = jnp.where(y >= 0, y, NEG_SLOPE * y)

    # one transpose: fused time -> sublanes, channels -> lanes
    yt = y.T                                           # (128, 8)

    # ---- MaxPool2d((1,2),(1,2)) + projection head, fully in registers ----
    # Pooled slabs h_j[n, s] = max(y[s, n*T+2j], y[s, n*T+2j+1]) are pulled out
    # with exact one-hot selection matmuls (built from iotas; windows that
    # would cross a sample boundary are never selected).
    ni = lax.broadcasted_iota(jnp.int32, (N, LANES), 0)
    ci = lax.broadcasted_iota(jnp.int32, (N, LANES), 1)
    base = ni * T                                      # start column of sample n

    bp_row = p_ref[S + LP * S:S + LP * S + 1, 0:P]     # (1, 16) projection bias
    p_acc = jnp.zeros((N, P), jnp.float32) + bp_row    # (4, 16)

    h_parts = []
    for j in range(LP):                                # static unroll (LP = 5)
        sel_e = (ci == base + 2 * j).astype(jnp.float32)         # (4, 128)
        sel_o = (ci == base + 2 * j + 1).astype(jnp.float32)
        h_j = jnp.maximum(
            jnp.dot(sel_e, yt, preferred_element_type=jnp.float32),
            jnp.dot(sel_o, yt, preferred_element_type=jnp.float32))  # (4, 8)
        h_parts.append(h_j)
        # projection weight block for pooled-time index j: wq_j[s, p] = wp[p, s*LP+j]
        wq_j = p_ref[S + j * S:S + (j + 1) * S, 0:P]              # (8, 16)
        p_acc = p_acc + jnp.dot(h_j, wq_j, preferred_element_type=jnp.float32)

    # ---- F.normalize(dim=-1, eps=1e-12) ----
    nrm = jnp.sqrt(jnp.sum(p_acc * p_acc, axis=-1, keepdims=True))
    z = p_acc / jnp.maximum(nrm, 1e-12)                # (4, 16)

    # ---- single dense store of the merged (h | z) output slab ----
    h_stack = jnp.stack(h_parts, axis=0)               # (LP, N, S)  [j, n, s]
    h_pad = jnp.concatenate(
        [h_stack, jnp.zeros((LP, N, P - S), jnp.float32)], axis=-1)  # (LP, N, P)
    out_ref[...] = jnp.concatenate([h_pad, z[None]], axis=0)         # (LP+1, N, P)


@jax.jit
def simclr_clr_forward(clr_batch_view_1, clr_batch_view_2, params):
    """CurrentSimCLR.forward(step='clr') -> (h_i, h_j, z_i, z_j)."""
    ws, bs, wt, bt, wp, bp = params
    hi = jax.lax.Precision.HIGHEST

    # ---- one-time parameter repack (shared by both views) ----
    # Compose Spatial Linear (C->S) with the VARConv (S->S, k=7): both are
    # linear and back-to-back in the model, so the composition is exact:
    #   y[o, c] = sum_{m,k} A[o,m,k] * x[m, c+k] + b_eff[o]
    A = jnp.einsum('oik,im->omk', wt, ws, precision=hi)            # (S, C, K)
    a_p = jnp.transpose(A, (0, 2, 1)).reshape(S, K * C)            # [o, k*C+m]
    b_eff = bt + jnp.einsum('oik,i->o', wt, bs, precision=hi)      # (S,)
    # projection weight regrouped per pooled-time index j: row j*S+s = wp[:, s*LP+j]
    wq = jnp.transpose(wp.reshape(P, S, LP), (2, 1, 0)).reshape(LP * S, P)

    # ONE packed parameter slab -> ONE input DMA.
    slab = jnp.zeros((SLAB_R, LANES), jnp.float32)
    slab = slab.at[0:S, 0:K * C].set(a_p)
    slab = slab.at[0:S, K * C:K * C + 1].set(b_eff[:, None])
    slab = slab.at[S:S + LP * S, 0:P].set(wq)
    slab = slab.at[S + LP * S:S + LP * S + 1, 0:P].set(bp[None, :])

    # ---- fuse both views on the lane axis + input im2col (layout plumbing) ----
    x = jnp.stack([clr_batch_view_1, clr_batch_view_2], axis=0)    # (V, B, C, T)
    x = jnp.transpose(x, (2, 0, 1, 3)).reshape(C, N * T)           # col = n*T + t
    xim = jnp.concatenate(
        [jnp.pad(x[:, k:], ((0, 0), (0, LANES - (N * T - k)))) for k in range(K)],
        axis=0)                                                    # (K*C, 128)

    out = pl.pallas_call(
        _clr_kernel,
        out_shape=jax.ShapeDtypeStruct((LP + 1, N, P), jnp.float32),
        in_specs=[pl.BlockSpec(memory_space=pltpu.MemorySpace.VMEM),   # im2col'd x
                  pl.BlockSpec(memory_space=pltpu.MemorySpace.VMEM)],  # param slab
        out_specs=pl.BlockSpec(memory_space=pltpu.MemorySpace.VMEM),
    )(xim, slab)

    # h comes out as [j, n, s]; the fix-up to the PyTorch flatten order
    # (s*LP + j) is one tiny fused slice+transpose+reshape on 640 floats.
    h_raw = out[:LP, :, :S]                                        # (LP, N, S)
    h = jnp.transpose(h_raw, (1, 2, 0)).reshape(V, B, NF)          # (V, B, 40)
    z = out[LP].reshape(V, B, P)                                   # (V, B, 16)
    return h[0], h[1], z[0], z[1]


def _reference(x, params):
    """Pure-JAX reference mirroring the PyTorch ops (for validation)."""
    ws, bs, wt, bt, wp, bp = params
    hi = jax.lax.Precision.HIGHEST
    xt = jnp.transpose(x, (0, 2, 1))                               # Transpose(1,2)
    sp = jnp.einsum('btc,sc->bts', xt, ws, precision=hi) + bs      # Spatial Linear
    sp = jnp.transpose(sp, (0, 2, 1))                              # Transpose(1,2)
    y = jax.lax.conv_general_dilated(                              # VARConv (valid)
        sp, wt, window_strides=(1,), padding='VALID',
        dimension_numbers=('NCH', 'OIH', 'NCH'),
        precision=hi) + bt[None, :, None]
    y = jnp.where(y >= 0, y, NEG_SLOPE * y)                        # LeakyReLU
    yp = jnp.max(y[:, :, :2 * LP].reshape(B, S, LP, 2), axis=-1)   # MaxPool (1,2)
    h = yp.reshape(B, NF)                                          # TensorView
    p = jnp.einsum('bf,pf->bp', h, wp, precision=hi) + bp          # projection_head
    z = p / jnp.maximum(jnp.linalg.norm(p, axis=-1, keepdims=True), 1e-12)
    return h, z


if __name__ == "__main__":
    key = jax.random.PRNGKey(0)
    keys = jax.random.split(key, 8)
    # deterministic synthetic parameters (torch-convention shapes)
    ws = jax.random.normal(keys[0], (S, C), jnp.float32) * 0.2     # Linear(C, S).weight
    bs = jax.random.normal(keys[1], (S,), jnp.float32) * 0.1       # Linear(C, S).bias
    wt = jax.random.normal(keys[2], (S, S, K), jnp.float32) * 0.1  # Conv1d(S, S, K).weight
    bt = jax.random.normal(keys[3], (S,), jnp.float32) * 0.1       # Conv1d bias
    wp = jax.random.normal(keys[4], (P, NF), jnp.float32) * 0.1    # Linear(NF, P).weight
    bp = jax.random.normal(keys[5], (P,), jnp.float32) * 0.1       # Linear(NF, P).bias
    params = (ws, bs, wt, bt, wp, bp)

    clr_batch_view_1 = jax.random.normal(keys[6], (B, C, T), jnp.float32)
    clr_batch_view_2 = jax.random.normal(keys[7], (B, C, T), jnp.float32)

    h_i, h_j, z_i, z_j = simclr_clr_forward(clr_batch_view_1, clr_batch_view_2, params)
    jax.block_until_ready((h_i, h_j, z_i, z_j))

    # validate against pure-JAX reference
    h_exp, z_exp = _reference(clr_batch_view_1, params)
    assert jnp.allclose(h_i, h_exp, atol=2e-3, rtol=2e-3), "h_i mismatch"
    assert jnp.allclose(z_i, z_exp, atol=2e-3, rtol=2e-3), "z_i mismatch"
    h_exp2, z_exp2 = _reference(clr_batch_view_2, params)
    assert jnp.allclose(h_j, h_exp2, atol=2e-3, rtol=2e-3), "h_j mismatch"
    assert jnp.allclose(z_j, z_exp2, atol=2e-3, rtol=2e-3), "z_j mismatch"

    print("KERNEL_OK")
</pallas_src>

<mosaic_0001>
module attributes {stable_mosaic.version = 11 : i64} {
  func.func @_clr_kernel(%arg0: memref<28x128xf32, #tpu.memory_space<vmem>>, %arg1: memref<56x128xf32, #tpu.memory_space<vmem>>, %arg2: memref<6x4x16xf32, #tpu.memory_space<vmem>>) attributes {dimension_semantics = [], scalar_prefetch = 0 : i64, scratch_operands = 0 : i64, tpu.core_type = #tpu.core_type<tc>} {
    %c0 = arith.constant 0 : index
    %c0_0 = arith.constant 0 : index
    %0 = vector.load %arg1[%c0, %c0_0] : memref<56x128xf32, #tpu.memory_space<vmem>>, vector<8x28xf32>
    %c0_1 = arith.constant 0 : index
    %c28 = arith.constant 28 : index
    %1 = vector.load %arg1[%c0_1, %c28] : memref<56x128xf32, #tpu.memory_space<vmem>>, vector<8x1xf32>
    %c0_2 = arith.constant 0 : index
    %c0_3 = arith.constant 0 : index
    %2 = vector.load %arg0[%c0_2, %c0_3] : memref<28x128xf32, #tpu.memory_space<vmem>>, vector<28x128xf32>
    %cst = arith.constant dense<0.000000e+00> : vector<8x128xf32>
    %3 = tpu.matmul %0, %2, %cst {dimension_numbers = #tpu.dot_dimension_numbers<[1], [0], [0], [1], [0, 0, 1, 1], [], []>} : vector<8x28xf32>, vector<28x128xf32>, vector<8x128xf32> -> vector<8x128xf32>
    %4 = vector.broadcast %1 : vector<8x1xf32> to vector<8x128xf32>
    %5 = arith.addf %3, %4 : vector<8x128xf32>
    %cst_4 = arith.constant 0.000000e+00 : f32
    %6 = vector.broadcast %cst_4 : f32 to vector<8x128xf32>
    %7 = arith.cmpf oge, %5, %6 : vector<8x128xf32>
    %cst_5 = arith.constant 0.00999999977 : f32
    %8 = vector.broadcast %cst_5 : f32 to vector<8x128xf32>
    %9 = arith.mulf %8, %5 : vector<8x128xf32>
    %10 = arith.select %7, %5, %9 : vector<8x128xi1>, vector<8x128xf32>
    %11 = tpu.transpose %10, [1, 0] : vector<8x128xf32> -> vector<128x8xf32>
    %12 = tpu.iota {dimensions = array<i32: 0>} : vector<4x128xi32>
    %13 = tpu.iota {dimensions = array<i32: 1>} : vector<4x128xi32>
    %c16_i32 = arith.constant 16 : i32
    %14 = vector.broadcast %c16_i32 : i32 to vector<4x128xi32>
    %15 = arith.muli %12, %14 : vector<4x128xi32>
    %c48 = arith.constant 48 : index
    %c0_6 = arith.constant 0 : index
    %16 = vector.load %arg1[%c48, %c0_6] : memref<56x128xf32, #tpu.memory_space<vmem>>, vector<1x16xf32>
    %cst_7 = arith.constant 0.000000e+00 : f32
    %17 = vector.broadcast %cst_7 : f32 to vector<4x16xf32>
    %18 = vector.broadcast %16 : vector<1x16xf32> to vector<4x16xf32>
    %19 = arith.addf %17, %18 : vector<4x16xf32>
    %c0_i32 = arith.constant 0 : i32
    %20 = vector.broadcast %c0_i32 : i32 to vector<4x128xi32>
    %21 = arith.addi %15, %20 : vector<4x128xi32>
    %22 = arith.cmpi eq, %13, %21 : vector<4x128xi32>
    %23 = arith.extui %22 : vector<4x128xi1> to vector<4x128xi32>
    %24 = arith.sitofp %23 : vector<4x128xi32> to vector<4x128xf32>
    %c0_i32_8 = arith.constant 0 : i32
    %25 = vector.broadcast %c0_i32_8 : i32 to vector<4x128xi32>
    %26 = arith.addi %15, %25 : vector<4x128xi32>
    %c1_i32 = arith.constant 1 : i32
    %27 = vector.broadcast %c1_i32 : i32 to vector<4x128xi32>
    %28 = arith.addi %26, %27 : vector<4x128xi32>
    %29 = arith.cmpi eq, %13, %28 : vector<4x128xi32>
    %30 = arith.extui %29 : vector<4x128xi1> to vector<4x128xi32>
    %31 = arith.sitofp %30 : vector<4x128xi32> to vector<4x128xf32>
    %cst_9 = arith.constant dense<0.000000e+00> : vector<4x8xf32>
    %32 = tpu.matmul %24, %11, %cst_9 {dimension_numbers = #tpu.dot_dimension_numbers<[1], [0], [0], [1], [0, 0, 1, 1], [], []>} : vector<4x128xf32>, vector<128x8xf32>, vector<4x8xf32> -> vector<4x8xf32>
    %cst_10 = arith.constant dense<0.000000e+00> : vector<4x8xf32>
    %33 = tpu.matmul %31, %11, %cst_10 {dimension_numbers = #tpu.dot_dimension_numbers<[1], [0], [0], [1], [0, 0, 1, 1], [], []>} : vector<4x128xf32>, vector<128x8xf32>, vector<4x8xf32> -> vector<4x8xf32>
    %34 = arith.maximumf %32, %33 : vector<4x8xf32>
    %c8 = arith.constant 8 : index
    %c0_11 = arith.constant 0 : index
    %35 = vector.load %arg1[%c8, %c0_11] : memref<56x128xf32, #tpu.memory_space<vmem>>, vector<8x16xf32>
    %cst_12 = arith.constant dense<0.000000e+00> : vector<4x16xf32>
    %36 = tpu.matmul %34, %35, %cst_12 {dimension_numbers = #tpu.dot_dimension_numbers<[1], [0], [0], [1], [0, 0, 1, 1], [], []>} : vector<4x8xf32>, vector<8x16xf32>, vector<4x16xf32> -> vector<4x16xf32>
    %37 = arith.addf %19, %36 : vector<4x16xf32>
    %c2_i32 = arith.constant 2 : i32
    %38 = vector.broadcast %c2_i32 : i32 to vector<4x128xi32>
    %39 = arith.addi %15, %38 : vector<4x128xi32>
    %40 = arith.cmpi eq, %13, %39 : vector<4x128xi32>
    %41 = arith.extui %40 : vector<4x128xi1> to vector<4x128xi32>
    %42 = arith.sitofp %41 : vector<4x128xi32> to vector<4x128xf32>
    %c2_i32_13 = arith.constant 2 : i32
    %43 = vector.broadcast %c2_i32_13 : i32 to vector<4x128xi32>
    %44 = arith.addi %15, %43 : vector<4x128xi32>
    %c1_i32_14 = arith.constant 1 : i32
    %45 = vector.broadcast %c1_i32_14 : i32 to vector<4x128xi32>
    %46 = arith.addi %44, %45 : vector<4x128xi32>
    %47 = arith.cmpi eq, %13, %46 : vector<4x128xi32>
    %48 = arith.extui %47 : vector<4x128xi1> to vector<4x128xi32>
    %49 = arith.sitofp %48 : vector<4x128xi32> to vector<4x128xf32>
    %cst_15 = arith.constant dense<0.000000e+00> : vector<4x8xf32>
    %50 = tpu.matmul %42, %11, %cst_15 {dimension_numbers = #tpu.dot_dimension_numbers<[1], [0], [0], [1], [0, 0, 1, 1], [], []>} : vector<4x128xf32>, vector<128x8xf32>, vector<4x8xf32> -> vector<4x8xf32>
    %cst_16 = arith.constant dense<0.000000e+00> : vector<4x8xf32>
    %51 = tpu.matmul %49, %11, %cst_16 {dimension_numbers = #tpu.dot_dimension_numbers<[1], [0], [0], [1], [0, 0, 1, 1], [], []>} : vector<4x128xf32>, vector<128x8xf32>, vector<4x8xf32> -> vector<4x8xf32>
    %52 = arith.maximumf %50, %51 : vector<4x8xf32>
    %c16 = arith.constant 16 : index
    %c0_17 = arith.constant 0 : index
    %53 = vector.load %arg1[%c16, %c0_17] : memref<56x128xf32, #tpu.memory_space<vmem>>, vector<8x16xf32>
    %cst_18 = arith.constant dense<0.000000e+00> : vector<4x16xf32>
    %54 = tpu.matmul %52, %53, %cst_18 {dimension_numbers = #tpu.dot_dimension_numbers<[1], [0], [0], [1], [0, 0, 1, 1], [], []>} : vector<4x8xf32>, vector<8x16xf32>, vector<4x16xf32> -> vector<4x16xf32>
    %55 = arith.addf %37, %54 : vector<4x16xf32>
    %c4_i32 = arith.constant 4 : i32
    %56 = vector.broadcast %c4_i32 : i32 to vector<4x128xi32>
    %57 = arith.addi %15, %56 : vector<4x128xi32>
    %58 = arith.cmpi eq, %13, %57 : vector<4x128xi32>
    %59 = arith.extui %58 : vector<4x128xi1> to vector<4x128xi32>
    %60 = arith.sitofp %59 : vector<4x128xi32> to vector<4x128xf32>
    %c4_i32_19 = arith.constant 4 : i32
    %61 = vector.broadcast %c4_i32_19 : i32 to vector<4x128xi32>
    %62 = arith.addi %15, %61 : vector<4x128xi32>
    %c1_i32_20 = arith.constant 1 : i32
    %63 = vector.broadcast %c1_i32_20 : i32 to vector<4x128xi32>
    %64 = arith.addi %62, %63 : vector<4x128xi32>
    %65 = arith.cmpi eq, %13, %64 : vector<4x128xi32>
    %66 = arith.extui %65 : vector<4x128xi1> to vector<4x128xi32>
    %67 = arith.sitofp %66 : vector<4x128xi32> to vector<4x128xf32>
    %cst_21 = arith.constant dense<0.000000e+00> : vector<4x8xf32>
    %68 = tpu.matmul %60, %11, %cst_21 {dimension_numbers = #tpu.dot_dimension_numbers<[1], [0], [0], [1], [0, 0, 1, 1], [], []>} : vector<4x128xf32>, vector<128x8xf32>, vector<4x8xf32> -> vector<4x8xf32>
    %cst_22 = arith.constant dense<0.000000e+00> : vector<4x8xf32>
    %69 = tpu.matmul %67, %11, %cst_22 {dimension_numbers = #tpu.dot_dimension_numbers<[1], [0], [0], [1], [0, 0, 1, 1], [], []>} : vector<4x128xf32>, vector<128x8xf32>, vector<4x8xf32> -> vector<4x8xf32>
    %70 = arith.maximumf %68, %69 : vector<4x8xf32>
    %c24 = arith.constant 24 : index
    %c0_23 = arith.constant 0 : index
    %71 = vector.load %arg1[%c24, %c0_23] : memref<56x128xf32, #tpu.memory_space<vmem>>, vector<8x16xf32>
    %cst_24 = arith.constant dense<0.000000e+00> : vector<4x16xf32>
    %72 = tpu.matmul %70, %71, %cst_24 {dimension_numbers = #tpu.dot_dimension_numbers<[1], [0], [0], [1], [0, 0, 1, 1], [], []>} : vector<4x8xf32>, vector<8x16xf32>, vector<4x16xf32> -> vector<4x16xf32>
    %73 = arith.addf %55, %72 : vector<4x16xf32>
    %c6_i32 = arith.constant 6 : i32
    %74 = vector.broadcast %c6_i32 : i32 to vector<4x128xi32>
    %75 = arith.addi %15, %74 : vector<4x128xi32>
    %76 = arith.cmpi eq, %13, %75 : vector<4x128xi32>
    %77 = arith.extui %76 : vector<4x128xi1> to vector<4x128xi32>
    %78 = arith.sitofp %77 : vector<4x128xi32> to vector<4x128xf32>
    %c6_i32_25 = arith.constant 6 : i32
    %79 = vector.broadcast %c6_i32_25 : i32 to vector<4x128xi32>
    %80 = arith.addi %15, %79 : vector<4x128xi32>
    %c1_i32_26 = arith.constant 1 : i32
    %81 = vector.broadcast %c1_i32_26 : i32 to vector<4x128xi32>
    %82 = arith.addi %80, %81 : vector<4x128xi32>
    %83 = arith.cmpi eq, %13, %82 : vector<4x128xi32>
    %84 = arith.extui %83 : vector<4x128xi1> to vector<4x128xi32>
    %85 = arith.sitofp %84 : vector<4x128xi32> to vector<4x128xf32>
    %cst_27 = arith.constant dense<0.000000e+00> : vector<4x8xf32>
    %86 = tpu.matmul %78, %11, %cst_27 {dimension_numbers = #tpu.dot_dimension_numbers<[1], [0], [0], [1], [0, 0, 1, 1], [], []>} : vector<4x128xf32>, vector<128x8xf32>, vector<4x8xf32> -> vector<4x8xf32>
    %cst_28 = arith.constant dense<0.000000e+00> : vector<4x8xf32>
    %87 = tpu.matmul %85, %11, %cst_28 {dimension_numbers = #tpu.dot_dimension_numbers<[1], [0], [0], [1], [0, 0, 1, 1], [], []>} : vector<4x128xf32>, vector<128x8xf32>, vector<4x8xf32> -> vector<4x8xf32>
    %88 = arith.maximumf %86, %87 : vector<4x8xf32>
    %c32 = arith.constant 32 : index
    %c0_29 = arith.constant 0 : index
    %89 = vector.load %arg1[%c32, %c0_29] : memref<56x128xf32, #tpu.memory_space<vmem>>, vector<8x16xf32>
    %cst_30 = arith.constant dense<0.000000e+00> : vector<4x16xf32>
    %90 = tpu.matmul %88, %89, %cst_30 {dimension_numbers = #tpu.dot_dimension_numbers<[1], [0], [0], [1], [0, 0, 1, 1], [], []>} : vector<4x8xf32>, vector<8x16xf32>, vector<4x16xf32> -> vector<4x16xf32>
    %91 = arith.addf %73, %90 : vector<4x16xf32>
    %c8_i32 = arith.constant 8 : i32
    %92 = vector.broadcast %c8_i32 : i32 to vector<4x128xi32>
    %93 = arith.addi %15, %92 : vector<4x128xi32>
    %94 = arith.cmpi eq, %13, %93 : vector<4x128xi32>
    %95 = arith.extui %94 : vector<4x128xi1> to vector<4x128xi32>
    %96 = arith.sitofp %95 : vector<4x128xi32> to vector<4x128xf32>
    %c8_i32_31 = arith.constant 8 : i32
    %97 = vector.broadcast %c8_i32_31 : i32 to vector<4x128xi32>
    %98 = arith.addi %15, %97 : vector<4x128xi32>
    %c1_i32_32 = arith.constant 1 : i32
    %99 = vector.broadcast %c1_i32_32 : i32 to vector<4x128xi32>
    %100 = arith.addi %98, %99 : vector<4x128xi32>
    %101 = arith.cmpi eq, %13, %100 : vector<4x128xi32>
    %102 = arith.extui %101 : vector<4x128xi1> to vector<4x128xi32>
    %103 = arith.sitofp %102 : vector<4x128xi32> to vector<4x128xf32>
    %cst_33 = arith.constant dense<0.000000e+00> : vector<4x8xf32>
    %104 = tpu.matmul %96, %11, %cst_33 {dimension_numbers = #tpu.dot_dimension_numbers<[1], [0], [0], [1], [0, 0, 1, 1], [], []>} : vector<4x128xf32>, vector<128x8xf32>, vector<4x8xf32> -> vector<4x8xf32>
    %cst_34 = arith.constant dense<0.000000e+00> : vector<4x8xf32>
    %105 = tpu.matmul %103, %11, %cst_34 {dimension_numbers = #tpu.dot_dimension_numbers<[1], [0], [0], [1], [0, 0, 1, 1], [], []>} : vector<4x128xf32>, vector<128x8xf32>, vector<4x8xf32> -> vector<4x8xf32>
    %106 = arith.maximumf %104, %105 : vector<4x8xf32>
    %c40 = arith.constant 40 : index
    %c0_35 = arith.constant 0 : index
    %107 = vector.load %arg1[%c40, %c0_35] : memref<56x128xf32, #tpu.memory_space<vmem>>, vector<8x16xf32>
    %cst_36 = arith.constant dense<0.000000e+00> : vector<4x16xf32>
    %108 = tpu.matmul %106, %107, %cst_36 {dimension_numbers = #tpu.dot_dimension_numbers<[1], [0], [0], [1], [0, 0, 1, 1], [], []>} : vector<4x8xf32>, vector<8x16xf32>, vector<4x16xf32> -> vector<4x16xf32>
    %109 = arith.addf %91, %108 : vector<4x16xf32>
    %110 = arith.mulf %109, %109 : vector<4x16xf32>
    %cst_37 = arith.constant dense<0.000000e+00> : vector<4xf32>
    %111 = vector.multi_reduction <add>, %110, %cst_37 [1] : vector<4x16xf32> to vector<4xf32>
    %112 = vector.shape_cast %111 : vector<4xf32> to vector<4x1xf32>
    %113 = math.sqrt %112 : vector<4x1xf32>
    %cst_38 = arith.constant 9.99999996E-13 : f32
    %114 = vector.broadcast %cst_38 : f32 to vector<4x1xf32>
    %115 = arith.maximumf %113, %114 : vector<4x1xf32>
    %116 = vector.broadcast %115 : vector<4x1xf32> to vector<4x16xf32>
    %117 = arith.divf %109, %116 : vector<4x16xf32>
    %118 = vector.shape_cast %34 : vector<4x8xf32> to vector<1x4x8xf32>
    %119 = vector.shape_cast %52 : vector<4x8xf32> to vector<1x4x8xf32>
    %120 = vector.shape_cast %70 : vector<4x8xf32> to vector<1x4x8xf32>
    %121 = vector.shape_cast %88 : vector<4x8xf32> to vector<1x4x8xf32>
    %122 = vector.shape_cast %106 : vector<4x8xf32> to vector<1x4x8xf32>
    %123 = tpu.concatenate %118, %119, %120, %121, %122 in 0 : vector<1x4x8xf32>, vector<1x4x8xf32>, vector<1x4x8xf32>, vector<1x4x8xf32>, vector<1x4x8xf32> -> vector<5x4x8xf32>
    %cst_39 = arith.constant 0.000000e+00 : f32
    %124 = vector.broadcast %cst_39 : f32 to vector<5x4x8xf32>
    %125 = tpu.concatenate %123, %124 in 2 : vector<5x4x8xf32>, vector<5x4x8xf32> -> vector<5x4x16xf32>
    %126 = vector.shape_cast %117 : vector<4x16xf32> to vector<1x4x16xf32>
    %127 = tpu.concatenate %125, %126 in 0 : vector<5x4x16xf32>, vector<1x4x16xf32> -> vector<6x4x16xf32>
    %c0_40 = arith.constant 0 : index
    %c0_41 = arith.constant 0 : index
    %c0_42 = arith.constant 0 : index
    %128 = vector.load %arg2[%c0_40, %c0_41, %c0_42] : memref<6x4x16xf32, #tpu.memory_space<vmem>>, vector<6x4x16xf32>
    tpu.vector_store %arg2[%c0_40, %c0_41, %c0_42], %127 {strides = array<i32>} : memref<6x4x16xf32, #tpu.memory_space<vmem>>, vector<6x4x16xf32>,
    return
  }
}

</mosaic_0001>

<bundles_post_ra>
// kernel: simclr_clr_forward.1
= control target key start
LH: loop header
LB: loop body
LE: loop exit
PB: predicated region body
PF: predicated region fallthrough
CT: control target
= control target key end

     0   :  { %v1438_v0 = vmov 0.0|0.0   ;;  %vm24_vm0 = vcmask 1043456   ;;  %vm1439_vm1 = vmmov 0   ;;  %v1440_v6 = vmov 0.0   ;;  %s1612_s0 = inlined_call_operand.vmem [shape: f32[28,128], index: 0, kind: input, shape index: {}]   ;;  %s1613_s1 = inlined_call_operand.vmem [shape: f32[56,128], index: 1, kind: input, shape index: {}]   ;;  %s1614_s2 = inlined_call_operand.vmem [shape: f32[6,4,16], index: 2, kind: output, shape index: {}]  }
   0x1   :  { %1411 = vmatprep.subr.bf16.mxu0 %v1438_v0  ;;  %v12_v1 = vld [vmem:[%s1612_s0] sm:$0xff]  ;;  %v13_v2 = vld [vmem:[%s1612_s0 + $0x8] sm:$0xff]  ;;  %v14_v3 = vld [vmem:[%s1612_s0 + $0x10] sm:$0xff]  ;;  %1333 = vmatprep.mubr.msk.f32.mxu0 %vm1439_vm1, %v1440_v6  ;;  %v1441_v8 = vmov 28   ;;  %vm1442_vm2 = vmmov 1   ;;  %vm21_vm4 = vcmask 228352   ;;  %v101_v10 = vlaneseq }
   0x2   :  { %v1412_v4 = vpack.c.bf16 %v13_v2, %v12_v1  ;;  %v15_v5 = vld [vmem:[%s1612_s0 + $0x18] sm:$0xf]  ;;  %v11_v7 = vld [vmem:[%s1613_s1] sm:$0xff]  ;;  %1433 = vset.pattern.permute.xlu0 %v1441_v8  ;;  %1336 = vmatprep.subr.mxu1 %v1440_v6  ;;  %vm1416_vm3 = vmpackc.low %vm24_vm0, %vm1442_vm2  ;;  %v1443_v21 = vmov 1.0   ;;  %vm261_vm13 = vcmask 64512   ;;  %vm1233_vm14 = vcmask 125952  }
   0x3   :  { %18 = vperm.xlu0 %1433, %v11_v7   ;;  %v1415_v9 = vpack.c.bf16 %v15_v5, %v14_v3  ;;  %1338 = vmatprep.mubr.msk.f32.mxu1 %vm1439_vm1, %v1440_v6  ;;  %v102_v12 = vshrl.u32 %v101_v10, 7  ;;  %v1482_v16 = vand.u32 127, %v101_v10  ;;  %v260_v27 = vld [vmem:[%s1613_s1 + $0x8] sm:$0xff]  ;;  %v485_v37 = vld [vmem:[%s1613_s1 + $0x10] sm:$0xff]  ;;  %v709_v50 = vld [vmem:[%s1613_s1 + $0x18] sm:$0xff] }
   0x4   :  { %1413 = vmatpush3.bf16.msra.mxu0 %v1412_v4  ;;  %v933_v53 = vld [vmem:[%s1613_s1 + $0x20] sm:$0xff]  ;;  %v1157_v63 = vld [vmem:[%s1613_s1 + $0x28] sm:$0xff]  ;;  %v1264_v1 = vld [vmem:[%s1613_s1 + $0x30] ss:$0 sm:$0xff] }
   0x5   :  { %1414 = vmatprep.subr.bf16.mxu0 %v1438_v0  ;;  %v105_v17 = vmul.u32 16, %v102_v12 }
   0x7   :  { %vm112_vm6 = vcmp.eq.s32.totalorder %v1482_v16, %v105_v17  ;;  %v115_v20 = vadd.s32 1, %v105_v17  ;;  %v336_v22 = vadd.s32 2, %v105_v17  ;;  %v560_v23 = vadd.s32 4, %v105_v17 }
   0x8   :  { %1417 = vmatpush3.bf16.msk.msra.mxu0 %vm1416_vm3, %v1415_v9  ;;  %v1512_v25 = vadd.s32 6, %v105_v17  ;;  %v1008_v26 = vadd.s32 8, %v105_v17 }
   0x9   :  { %1346 = vmatprep.subr.mxu0 %v1440_v6  ;;  %vm116_vm7 = vcmp.eq.s32.totalorder %v1482_v16, %v115_v20  ;;  %vm337_vm8 = vcmp.eq.s32.totalorder %v1482_v16, %v336_v22  ;;  %vm561_vm9 = vcmp.eq.s32.totalorder %v1482_v16, %v560_v23  ;;  %v564_v24 = vadd.s32 1, %v560_v23 }
   0xa   :  { %vm785_vm11 = vcmp.eq.s32.totalorder %v1482_v16, %v1512_v25  ;;  %vm1009_vm12 = vcmp.eq.s32.totalorder %v1482_v16, %v1008_v26  ;;  %v340_v31 = vadd.s32 1, %v336_v22  ;;  %v1012_v44 = vadd.s32 1, %v1008_v26 }
   0xb   :  { %1334 = vmatmul.mubr.msk.f32.vlgmr.msra.gmra.mrb[0].mxu0 %vm21_vm4, %v11_v7  ;;  %vm565_vm10 = vcmp.eq.s32.totalorder %v1482_v16, %v564_v24  ;;  %v788_v52 = vadd.s32 1, %v1512_v25 }
   0xc   :  { %1348 = vmatprep.mubr.msk.f32.mxu0 %vm1439_vm1, %v1440_v6  ;;  %1347 = vmatpush3.msra.mxu0 %v260_v27  ;;  %vm341_vm15 = vcmp.eq.s32.totalorder %v1482_v16, %v340_v31  ;;  %vm1013_vm0 = vcmp.eq.s32.totalorder %v1482_v16, %v1012_v44 }
   0xd   :  { %1356 = vmatprep.subr.mxu0 %v1440_v6  ;;  %vm789_vm2 = vcmp.eq.s32.totalorder %v1482_v16, %v788_v52 }
  0x82   :  { %v19_v11 = vpop.permute.xlu0 %18 }
  0xde   :  { %v94_v13 = vpop.f32.mrb[0].mxu0 }
  0xdf   :  { %v95_v14 = vadd.f32 %v94_v13, %v19_v11  ;;  %v1335_v15 = vpop.f32.mrb[1].mxu0 }
  0xe1   :  { %vm98_vm5 = vcmp.ge.f32.partialorder %v95_v14, 0.0  ;;  %v99_v18 = vmul.f32 0.01, %v95_v14 }
  0xe3   :  { %v1484_v19 = vsel %vm98_vm5, %v95_v14, %v99_v18 }
  0xe4   :  { %1337 = vmatpush3.xpose.msra.mxu1 %v1484_v19 }
  0xe5   :  { %1341 = vmatprep.subr.mxu1 %v1440_v6 }
  0xe7   :  { %1339 = vmatmul.mubr.msk.f32.vlgmr.msra.gmra.mrb[0].mxu1 %vm112_vm6, %v1443_v21 }
  0xe8   :  { %1342 = vmatpush3.xpose.msra.mxu1 %v1484_v19  ;;  %1343 = vmatprep.mubr.msk.f32.mxu1 %vm1439_vm1, %v1440_v6 }
  0xe9   :  { %1351 = vmatprep.subr.mxu1 %v1440_v6 }
  0xeb   :  { %1344 = vmatmul.mubr.msk.f32.vlgmr.msra.gmra.mrb[2].mxu1 %vm116_vm7, %v1443_v21 }
  0xec   :  { %1352 = vmatpush3.xpose.msra.mxu1 %v1484_v19  ;;  %1353 = vmatprep.mubr.msk.f32.mxu1 %vm1439_vm1, %v1440_v6 }
  0xed   :  { %1366 = vmatprep.subr.mxu1 %v1440_v6 }
  0xef   :  { %1354 = vmatmul.mubr.msk.f32.vlgmr.msra.gmra.mrb[4].mxu1 %vm337_vm8, %v1443_v21 }
  0xf0   :  { %1367 = vmatpush3.xpose.msra.mxu1 %v1484_v19  ;;  %1368 = vmatprep.mubr.msk.f32.mxu1 %vm1439_vm1, %v1440_v6 }
  0xf1   :  { %1371 = vmatprep.subr.mxu1 %v1440_v6 }
  0xf3   :  { %1369 = vmatmul.mubr.msk.f32.vlgmr.msra.gmra.mrb[6].mxu1 %vm561_vm9, %v1443_v21 }
  0xf4   :  { %1372 = vmatpush3.xpose.msra.mxu1 %v1484_v19  ;;  %1373 = vmatprep.mubr.msk.f32.mxu1 %vm1439_vm1, %v1440_v6 }
  0xf5   :  { %1381 = vmatprep.subr.mxu1 %v1440_v6 }
  0xf7   :  { %1374 = vmatmul.mubr.msk.f32.vlgmr.msra.gmra.mrb[8].mxu1 %vm565_vm10, %v1443_v21 }
  0xf8   :  { %1382 = vmatpush3.xpose.msra.mxu1 %v1484_v19  ;;  %1383 = vmatprep.mubr.msk.f32.mxu1 %vm1439_vm1, %v1440_v6 }
  0xf9   :  { %1396 = vmatprep.subr.mxu1 %v1440_v6 }
  0xfb   :  { %1384 = vmatmul.mubr.msk.f32.vlgmr.msra.gmra.mrb[10].mxu1 %vm785_vm11, %v1443_v21 }
  0xfc   :  { %1397 = vmatpush3.xpose.msra.mxu1 %v1484_v19  ;;  %1398 = vmatprep.mubr.msk.f32.mxu1 %vm1439_vm1, %v1440_v6 }
  0xfd   :  { %1401 = vmatprep.subr.mxu1 %v1440_v6 }
  0xff   :  { %1399 = vmatmul.mubr.msk.f32.vlgmr.msra.gmra.mrb[12].mxu1 %vm1009_vm12, %v1443_v21 }
 0x100   :  { %1402 = vmatpush3.xpose.msra.mxu1 %v1484_v19  ;;  %1403 = vmatprep.mubr.msk.f32.mxu1 %vm1439_vm1, %v1440_v6 }
 0x103   :  { %1404 = vmatmul.mubr.msk.f32.vlgmr.msra.gmra.mrb[14].mxu1 %vm1013_vm0, %v1443_v21 }
 0x1ba   :  { %v185_v28 = vpop.f32.mrb[0].mxu1 }
 0x1bb   :  { %v1340_v29 = vpop.f32.mrb[1].mxu1 }
 0x1be   :  { %v255_v30 = vpop.f32.mrb[2].mxu1 }
 0x1bf   :  { %v259_v32 = vmax.f32 %v185_v28, %v255_v30  ;;  %v1345_v33 = vpop.f32.mrb[3].mxu1 }
 0x1c1   :  { %v1247_v34 = vsel %vm261_vm13, %v259_v32, 0.0  ;;  %1349 = vmatmul.mubr.msk.f32.vlgmr.msra.gmra.mrb[2].mxu0 %vm261_vm13, %v259_v32 }
 0x1c2   :  { %1252 = vst.msk [vmem:[%s1614_s2] sm:$0xf] %vm1233_vm14, %v1247_v34  ;;  %1357 = vmatpush3.xpose.msra.mxu0 %v1484_v19  ;;  %1358 = vmatprep.mubr.msk.f32.mxu0 %vm1439_vm1, %v1440_v6  ;;  %v410_v35 = vpop.f32.mrb[4].mxu1 }
 0x1c3   :  { %1361 = vmatprep.subr.mxu0 %v1440_v6  ;;  %v1355_v36 = vpop.f32.mrb[5].mxu1 }
 0x1c5   :  { %1359 = vmatmul.mubr.msk.f32.vlgmr.msra.gmra.mrb[4].mxu0 %vm341_vm15, %v1443_v21 }
 0x1c6   :  { %1363 = vmatprep.mubr.msk.f32.mxu0 %vm1439_vm1, %v1440_v6  ;;  %1362 = vmatpush3.msra.mxu0 %v485_v37  ;;  %v634_v38 = vpop.f32.mrb[6].mxu1 }
 0x1c7   :  { %1376 = vmatprep.subr.mxu0 %v1440_v6  ;;  %v1370_v39 = vpop.f32.mrb[7].mxu1 }
 0x1ca   :  { %v704_v40 = vpop.f32.mrb[8].mxu1 }
 0x1cb   :  { %v708_v41 = vmax.f32 %v634_v38, %v704_v40  ;;  %v1375_v42 = vpop.f32.mrb[9].mxu1 }
 0x1cd   :  { %v1249_v43 = vsel %vm261_vm13, %v708_v41, 0.0 }
 0x1ce   :  { %1254 = vst.msk [vmem:[%s1614_s2 + $0x8] sm:$0xf] %vm1233_vm14, %v1249_v43  ;;  %v858_v45 = vpop.f32.mrb[10].mxu1 }
 0x1cf   :  { %v1385_v46 = vpop.f32.mrb[11].mxu1 }
 0x1d2   :  { %v1082_v54 = vpop.f32.mrb[12].mxu1 }
 0x1d3   :  { %v1400_v55 = vpop.f32.mrb[13].mxu1 }
 0x1d6   :  { %v1152_v56 = vpop.f32.mrb[14].mxu1 }
 0x1d7   :  { %v1156_v57 = vmax.f32 %v1082_v54, %v1152_v56  ;;  %v1405_v58 = vpop.f32.mrb[15].mxu1 }
 0x1d9   :  { %v1251_v59 = vsel %vm261_vm13, %v1156_v57, 0.0 }
 0x1da   :  { %1256 = vst.msk [vmem:[%s1614_s2 + $0x10] sm:$0xf] %vm1233_vm14, %v1251_v59 }
 0x298   :  { %v480_v47 = vpop.f32.mrb[4].mxu0 }
 0x299   :  { %v484_v48 = vmax.f32 %v410_v35, %v480_v47  ;;  %v1360_v49 = vpop.f32.mrb[5].mxu0 }
 0x29b   :  { %v1248_v51 = vsel %vm261_vm13, %v484_v48, 0.0  ;;  %1364 = vmatmul.mubr.msk.f32.vlgmr.msra.gmra.mrb[2].mxu0 %vm261_vm13, %v484_v48 }
 0x29c   :  { %1253 = vst.msk [vmem:[%s1614_s2 + $0x4] sm:$0xf] %vm1233_vm14, %v1248_v51  ;;  %1377 = vmatpush3.msra.mxu0 %v709_v50  ;;  %1378 = vmatprep.mubr.msk.f32.mxu0 %vm1439_vm1, %v1440_v6 }
 0x29d   :  { %1386 = vmatprep.subr.mxu0 %v1440_v6 }
 0x2a3   :  { %1379 = vmatmul.mubr.msk.f32.vlgmr.msra.gmra.mrb[2].mxu0 %vm261_vm13, %v708_v41 }
 0x2a4   :  { %1387 = vmatpush3.xpose.msra.mxu0 %v1484_v19  ;;  %1388 = vmatprep.mubr.msk.f32.mxu0 %vm1439_vm1, %v1440_v6 }
 0x2a5   :  { %1391 = vmatprep.subr.mxu0 %v1440_v6 }
 0x2a7   :  { %1389 = vmatmul.mubr.msk.f32.vlgmr.msra.gmra.mrb[6].mxu0 %vm789_vm2, %v1443_v21 }
 0x2a8   :  { %1393 = vmatprep.mubr.msk.f32.mxu0 %vm1439_vm1, %v1440_v6  ;;  %1392 = vmatpush3.msra.mxu0 %v933_v53 }
 0x2a9   :  { %1406 = vmatprep.subr.mxu0 %v1440_v6 }
 0x37a   :  { %v928_v60 = vpop.f32.mrb[6].mxu0 }
 0x37b   :  { %v932_v61 = vmax.f32 %v858_v45, %v928_v60  ;;  %v1390_v62 = vpop.f32.mrb[7].mxu0 }
 0x37d   :  { %v1250_v0 = vsel %vm261_vm13, %v932_v61, 0.0  ;;  %1394 = vmatmul.mubr.msk.f32.vlgmr.msra.gmra.mrb[2].mxu0 %vm261_vm13, %v932_v61 }
 0x37e   :  { %1255 = vst.msk [vmem:[%s1614_s2 + $0xc] sm:$0xf] %vm1233_vm14, %v1250_v0  ;;  %1407 = vmatpush3.msra.mxu0 %v1157_v63  ;;  %1408 = vmatprep.mubr.msk.f32.mxu0 %vm1439_vm1, %v1440_v6 }
 0x385   :  { %1409 = vmatmul.mubr.msk.f32.vlgmr.msra.gmra.mrb[2].mxu0 %vm261_vm13, %v1156_v57 }
 0x458   :  { %v1227_v2 = vpop.f32.mrb[2].mxu0 }
 0x459   :  { %v1418_v3 = vadd.f32 %v1264_v1, %v1227_v2  ;;  %v1410_v4 = vpop.f32.mrb[3].mxu0 }
 0x45b   :  { %v1232_v5 = vmul.f32 %v1418_v3, %v1418_v3 }
 0x45d   :  { %v1234_v7 = vsel %vm1233_vm14, %v1232_v5, 0.0 }
 0x45e   :  { %1235 = vadd.xlane.f32.xlu0 %v1234_v7 }
 0x4eb   :  { %v1236_v8 = vpop.xlane.xlu0 %1235 }
 0x4ec   :  { %1434 = vrsqrt.f32 %v1236_v8  ;;  %vm1239_vm3 = vcmp.eq.f32.partialorder %v1236_v8, inf  ;;  %v1242_v11 = vand.u32 2147483648, %v1236_v8  ;;  %vm1241_vm1 = vcmp.eq.f32.partialorder %v1236_v8, 0.0 }
 0x4f6   :  { %v1435_v9 = vpop.eup %1434 }
 0x4f7   :  { %v1238_v10 = vmul.f32 %v1435_v9, %v1236_v8 }
 0x4f9   :  { %v1240_v6 = vsel %vm1239_vm3, %v1236_v8, %v1238_v10 }
 0x4fa   :  { %v1243_v12 = vsel %vm1241_vm1, %v1242_v11, %v1240_v6 }
 0x4fb   :  { %v1244_v13 = vmax.f32 %v1243_v12, 1e-12 }
 0x4fd   :  { %1436 = vrcp.f32 %v1244_v13 }
 0x507   :  { %v1437_v14 = vpop.eup %1436 }
 0x508   :  { %v1246_v15 = vmul.f32 %v1437_v14, %v1418_v3 }
 0x50a   :  { %1257 = vst.msk [vmem:[%s1614_s2 + $0x14] sm:$0xf] %vm1233_vm14, %v1246_v15 }

// kernel: squeeze.6
= control target key start
LH: loop header
LB: loop body
LE: loop exit
PB: predicated region body
PF: predicated region fallthrough
CT: control target
= control target key end

     0   :  { %s8_s6 = smov 3  ;;  %s22_s9 = smov 3  ;;  %s165_s0 = inlined_call_operand.vmem [shape: f32[2,8,5], index: 0, kind: input, shape index: {}]   ;;  %s166_s1 = inlined_call_operand.hbm [shape: f32[2,40], index: 1, kind: output, shape index: {}]  }
   0x1   :  { %v72_v0 = vld [vmem:[%s165_s0 + $0x7] ss:$8 sm:%s8_s6]   ;;  %s111_s10 = smov 35   ;;  %v74_v1 = vld [vmem:[%s165_s0 + $0x5] ss:$8 sm:%s22_s9]   ;;  %s15_s13 = smov 3 }
   0x2   :  { %10 = vrot.lane.b32.xlu0 %v72_v0, %s111_s10  ;;  %s112_s14 = smov 25   ;;  %v73_v2 = vld [vmem:[%s165_s0 + $0x6] ss:$8 sm:%s15_s13]   ;;  %s29_s17 = smov 3 }
   0x3   :  { %24 = vrot.lane.b32.xlu1 %v74_v1, %s112_s14 }
   0x4   :  { %2 = vsyncpa [#allocation1], 0  ;;  %v75_v3 = vld [vmem:[%s165_s0 + $0x4] ss:$8 sm:%s29_s17]   ;;  %s36_s20 = smov 3  ;;  %s43_s21 = smov 3 }
   0x5   :  { %s113_s22 = smov 30   ;;  %vm5_vm0 = vcmask 39936   ;;  %s114_s23 = smov 20   ;;  %v76_v4 = vld [vmem:[%s165_s0 + $0x3] ss:$8 sm:%s36_s20]   ;;  %vm12_vm1 = vcmask 326936  }
   0x6   :  { %17 = vrot.lane.b32.xlu0 %v73_v2, %s113_s22  ;;  %s3_s26 = smov 3  ;;  %v77_v5 = vld [vmem:[%s165_s0 + $0x2] ss:$8 sm:%s43_s21]   ;;  %s50_s29 = smov 3  ;;  %vm19_vm2 = vcmask 285936   ;;  %vm26_vm3 = vcmask 244936  }
   0x7   :  { %31 = vrot.lane.b32.xlu1 %v75_v3, %s114_s23  ;;  %v4_v6 = vld [vmem:[%s165_s0] ss:$8 sm:%s3_s26]   ;;  %s115_s3 = smov 15   ;;  %s116_s4 = smov 10   ;;  %vm33_vm4 = vcmask 203936   ;;  %vm40_vm5 = vcmask 162936  }
   0x8   :  { %6 = vst.msk [vmem:[#allocation2] sm:$0x3] %vm5_vm0, %v4_v6   ;;  %v78_v7 = vld [vmem:[%s165_s0 + $0x1] ss:$8 sm:%s50_s29]   ;;  %s117_s0 = smov 5   ;;  %vm47_vm6 = vcmask 121936  }
   0x9   :  { %vm54_vm7 = vcmask 80936   ;;  %s118_s7 = smov [#allocation0]  }
   0xa   :  { %38 = vrot.lane.b32.xlu0 %v76_v4, %s115_s3  ;;  %s66_s8 = sshll.u32 %s118_s7, 4  ;;  %s67_s8 = int_to_ptr.vmem [resolvable:$true] %s66_s8 }
   0xb   :  { %45 = vrot.lane.b32.xlu1 %v77_v5, %s116_s4  ;;  %s87_s9 = scalar_lea.vmem %s67_s8, 32  ;;  %p92_p1 = scmp.lt.s32.totalorder %s67_s8, %s67_s8 }
   0xc   :  { %p88_p0 = scmp.ne.s32.totalorder %s67_s8, %s87_s9  ;;  %p93_p2 = scmp.lt.s32.totalorder %s87_s9, %s87_s9 }
   0xe   :  { %52 = vrot.lane.b32.xlu0 %v78_v7, %s117_s0  ;;  %p94_p3 = por %p93_p2, %p92_p1 }
  0x10   :  { %p95_p4 = pnand %p94_p3, %p88_p0 }
  0x74   :  { %v11_v8 = vpop.permute.xlu0 %10  }
  0x75   :  { %13 = vst.msk [vmem:[#allocation2] sm:$0x3] %vm12_vm1, %v11_v8   ;;  %v25_v9 = vpop.permute.xlu1 %24  }
  0x78   :  { %v18_v10 = vpop.permute.xlu0 %17  }
  0x79   :  { %20 = vst.msk [vmem:[#allocation2] sm:$0x3] %vm19_vm2, %v18_v10   ;;  %v32_v11 = vpop.permute.xlu1 %31  }
  0x7a   :  { %27 = vst.msk [vmem:[#allocation2] sm:$0x3] %vm26_vm3, %v25_v9  }
  0x7b   :  { %34 = vst.msk [vmem:[#allocation2] sm:$0x3] %vm33_vm4, %v32_v11  }
  0x7c   :  { %v39_v12 = vpop.permute.xlu0 %38  }
  0x7d   :  { %41 = vst.msk [vmem:[#allocation2] sm:$0x3] %vm40_vm5, %v39_v12   ;;  %v46_v13 = vpop.permute.xlu1 %45  }
  0x7e   :  { %48 = vst.msk [vmem:[#allocation2] sm:$0x3] %vm47_vm6, %v46_v13  }
  0x80   :  { %v53_v14 = vpop.permute.xlu0 %52  }
  0x81   :  { %55 = vst.msk [vmem:[#allocation2] sm:$0x3] %vm54_vm7, %v53_v14  }
  0x88   :  { %v59_v15 = vld [vmem:[#allocation2] sm:$0x3] }
  0x89   :  { %61 = vst [vmem:[#allocation0] sm:$0x3] %v59_v15 }
  0x8a   :  { %98 = shalt.err (!%p95_p4)
}
  0x8b   :  { %s99_s12 = scalar_lea.hbm %s166_s1, 32 }
  0x8c   :  { %p100_p5 = scmp.ne.s32.totalorder %s166_s1, %s99_s12  ;;  %p103_p6 = scmp.lt.u32.totalorder %s99_s12, %s166_s1 }
  0x8e   :  { %p105_p7 = pnand %p103_p6, %p100_p5 }
  0x90   :  { %108 = shalt.err (!%p105_p7)
}
  0x91   :  { %69 = dma.vmem_to_hbm [thread:$0]  %s67_s8, 32, %s166_s1, [#allocation1]  }
  0x92   :  { %109 = dma.done.wait [#allocation1], 32  }
  0x93   :  { %110 = vsyncadd [#allocation1], 4294967264 }
  0x94   :  { %71 = vsyncpa [#allocation1], 1 }

</bundles_post_ra>
